<compile_context>
chip_gen: v5e
topology: v5e:2x2
jax: 0.10.0
libtpu: 0.0.40
codegen_flags: <defaults>
</compile_context>

<pallas_src>
import math
import functools

import jax
import jax.numpy as jnp
from jax import lax
from jax.experimental import pallas as pl
from jax.experimental.pallas import tpu as pltpu


def _round_up(x, m):
    return ((x + m - 1) // m) * m


def _make_flash_kernel(scale, needs_mask, valid_in_last_tile):
    """scale / needs_mask / valid_in_last_tile are Python-level constants."""

    def kernel(q_ref, k_ref, v_ref, o_ref, qs_sc, m_sc, l_sc, acc_sc):
        ki = pl.program_id(2)
        last_ki = pl.num_programs(2) - 1

        @pl.when(ki == 0)
        def _():
            # The q block index (b, qi, 0) is constant across ki, so fold the
            # sqrt(D) scale into q ONCE per (b, qi) group instead of every step.
            qs_sc[...] = q_ref[0] * jnp.array(scale, dtype=q_ref.dtype)
            m_sc[...] = jnp.full_like(m_sc, -jnp.inf)
            l_sc[...] = jnp.zeros_like(l_sc)
            acc_sc[...] = jnp.zeros_like(acc_sc)

        k = k_ref[0]                                          # (tk, D)
        v = v_ref[0]                                          # (tk, D)

        # s = (q * sqrt(D)) @ k^T, contracting D directly (no explicit k.T).
        s = lax.dot_general(
            qs_sc[...], k,
            dimension_numbers=(((1,), (1,)), ((), ())),
            preferred_element_type=jnp.float32,
        )                                                     # (tq, tk) f32

        if needs_mask:
            # Only the final Sk tile contains padded key columns; gate the
            # iota + compare + select on a scalar predicate so non-final
            # steps skip the VALU work entirely.
            def _mask_tail(scores):
                col = lax.broadcasted_iota(jnp.int32, scores.shape, 1)
                return jnp.where(col < valid_in_last_tile, scores, -jnp.inf)

            s = lax.cond(ki == last_ki, _mask_tail, lambda scores: scores, s)

        m_prev = m_sc[...]
        m_new = jnp.maximum(m_prev, jnp.max(s, axis=-1, keepdims=True))
        alpha = jnp.exp(m_prev - m_new)
        p = jnp.exp(s - m_new)                                # (tq, tk) f32

        l_sc[...] = alpha * l_sc[...] + jnp.sum(p, axis=-1, keepdims=True)
        acc_sc[...] = alpha * acc_sc[...] + jnp.dot(
            p.astype(v.dtype), v, preferred_element_type=jnp.float32)
        m_sc[...] = m_new

        @pl.when(ki == last_ki)
        def _():
            inv_l = pl.reciprocal(l_sc[...], approx=True)
            o_ref[0] = (acc_sc[...] * inv_l).astype(o_ref.dtype)

    return kernel


@functools.partial(jax.jit, static_argnames=("tq", "tk"))
def attention(q, k, v, *, tq=512, tk=512):
    """q: (B, Sq, D), k/v: (B, Sk, D) -> (B, Sq, D)."""
    B, Sq, D = q.shape
    _, Sk, _ = k.shape

    # PyTorch module: inv_scale_factor = 1/sqrt(D); qk.div(inv_scale_factor)
    # == qk * sqrt(D).  Reproduced exactly (intentionally non-standard).
    scale = math.sqrt(D)

    # Tile sizes: lane-dense tk (multiple of 128), sublane-aligned tq (mult 8),
    # clamped to the padded problem size.
    tq = min(tq, _round_up(Sq, 8))
    tk = min(tk, _round_up(Sk, 128))
    # v7x has 2 TensorCores: keep at least 2 parallel (b, qi) work units when
    # B == 1 by capping tq at ~Sq/2 (no cost on v5e/v6e, 1 TC).
    if B == 1 and Sq // 2 >= 8:
        tq = min(tq, _round_up(pl.cdiv(Sq, 2), 8))

    sq_p = _round_up(Sq, tq)
    sk_p = _round_up(Sk, tk)

    qp = q if sq_p == Sq else jnp.pad(q, ((0, 0), (0, sq_p - Sq), (0, 0)))
    kp = k if sk_p == Sk else jnp.pad(k, ((0, 0), (0, sk_p - Sk), (0, 0)))
    vp = v if sk_p == Sk else jnp.pad(v, ((0, 0), (0, sk_p - Sk), (0, 0)))

    num_q_tiles = sq_p // tq
    num_k_tiles = sk_p // tk
    grid = (B, num_q_tiles, num_k_tiles)

    needs_mask = sk_p != Sk
    valid_in_last_tile = Sk - (num_k_tiles - 1) * tk  # real key cols in tail tile

    itemsize = jnp.dtype(q.dtype).itemsize
    cost = pl.CostEstimate(
        flops=4 * B * sq_p * sk_p * D,
        transcendentals=B * sq_p * sk_p,
        # K/V are re-streamed from HBM once per q tile.
        bytes_accessed=(qp.size + B * sq_p * D
                        + num_q_tiles * (kp.size + vp.size)) * itemsize,
    )

    out = pl.pallas_call(
        _make_flash_kernel(scale, needs_mask, valid_in_last_tile),
        out_shape=jax.ShapeDtypeStruct((B, sq_p, D), q.dtype),
        grid_spec=pltpu.PrefetchScalarGridSpec(
            num_scalar_prefetch=0,
            grid=grid,
            in_specs=[
                pl.BlockSpec((1, tq, D), lambda b, qi, ki: (b, qi, 0)),
                pl.BlockSpec((1, tk, D), lambda b, qi, ki: (b, ki, 0)),
                pl.BlockSpec((1, tk, D), lambda b, qi, ki: (b, ki, 0)),
            ],
            out_specs=pl.BlockSpec((1, tq, D), lambda b, qi, ki: (b, qi, 0)),
            scratch_shapes=[
                pltpu.VMEM((tq, D), q.dtype),       # pre-scaled q (hoisted)
                pltpu.VMEM((tq, 1), jnp.float32),   # running max m
                pltpu.VMEM((tq, 1), jnp.float32),   # running sum l
                pltpu.VMEM((tq, D), jnp.float32),   # output accumulator
            ],
        ),
        compiler_params=pltpu.CompilerParams(
            dimension_semantics=("parallel", "parallel", "arbitrary"),
            vmem_limit_bytes=32 * 1024 * 1024,
        ),
        cost_estimate=cost,
    )(qp, kp, vp)

    if sq_p != Sq:
        out = out[:, :Sq, :]
    return out


def _reference(q, k, v):
    d = q.shape[-1]
    qk = jnp.einsum("bqd,bkd->bqk", q.astype(jnp.float32), k.astype(jnp.float32))
    scaled_qk = qk / (1.0 / jnp.sqrt(jnp.float32(d)))
    p = jax.nn.softmax(scaled_qk, axis=-1)
    return jnp.einsum("bqk,bkd->bqd", p, v.astype(jnp.float32)).astype(q.dtype)


if __name__ == "__main__":
    key = jax.random.PRNGKey(0)

    # Case 1: exact shapes from the PyTorch spec (1, 1, 128).
    kq, kk, kv, key = jax.random.split(key, 4)
    q1 = jax.random.uniform(kq, (1, 1, 128), dtype=jnp.float32)
    k1 = jax.random.uniform(kk, (1, 1, 128), dtype=jnp.float32)
    v1 = jax.random.uniform(kv, (1, 1, 128), dtype=jnp.float32)
    out1 = jax.block_until_ready(attention(q1, k1, v1))
    ref1 = _reference(q1, k1, v1)
    assert out1.shape == (1, 1, 128)
    assert jnp.allclose(out1, ref1, atol=2e-3, rtol=2e-3), "mismatch (spec shape)"

    # Case 2: shapes that exercise the flash tiling with batch parallelism.
    kq, kk, kv, key = jax.random.split(key, 4)
    B, Sq, Sk, D = 2, 256, 256, 128
    q2 = jax.random.uniform(kq, (B, Sq, D), dtype=jnp.float32)
    k2 = jax.random.uniform(kk, (B, Sk, D), dtype=jnp.float32)
    v2 = jax.random.uniform(kv, (B, Sk, D), dtype=jnp.float32)
    out2 = jax.block_until_ready(attention(q2, k2, v2))
    ref2 = _reference(q2, k2, v2)
    assert out2.shape == (B, Sq, D)
    assert jnp.allclose(out2, ref2, atol=2e-3, rtol=2e-3), "mismatch (tiled shape)"

    # Case 3: ragged Sq/Sk with B=1 — exercises the tail-tile mask, the
    # multi-step online-softmax reduction, and the B==1 tq cap (2 q tiles).
    kq, kk, kv, key = jax.random.split(key, 4)
    B, Sq, Sk, D = 1, 300, 640, 128
    q3 = jax.random.uniform(kq, (B, Sq, D), dtype=jnp.float32)
    k3 = jax.random.uniform(kk, (B, Sk, D), dtype=jnp.float32)
    v3 = jax.random.uniform(kv, (B, Sk, D), dtype=jnp.float32)
    out3 = jax.block_until_ready(attention(q3, k3, v3))
    ref3 = _reference(q3, k3, v3)
    assert out3.shape == (B, Sq, D)
    assert jnp.allclose(out3, ref3, atol=2e-3, rtol=2e-3), "mismatch (ragged shape)"

    print("KERNEL_OK")
</pallas_src>

<mosaic_0001>
module attributes {stable_mosaic.version = 11 : i64} {
  func.func @kernel(%arg0: i32, %arg1: i32, %arg2: i32, %arg3: memref<1x8x128xf32, #tpu.memory_space<vmem>>, %arg4: memref<1x128x128xf32, #tpu.memory_space<vmem>>, %arg5: memref<1x128x128xf32, #tpu.memory_space<vmem>>, %arg6: memref<1x8x128xf32, #tpu.memory_space<vmem>>, %arg7: memref<8x128xf32, #tpu.memory_space<vmem>>, %arg8: memref<8x1xf32, #tpu.memory_space<vmem>>, %arg9: memref<8x1xf32, #tpu.memory_space<vmem>>, %arg10: memref<8x128xf32, #tpu.memory_space<vmem>>) attributes {dimension_semantics = [#tpu.dimension_semantics<parallel>, #tpu.dimension_semantics<parallel>, #tpu.dimension_semantics<arbitrary>], iteration_bounds = array<i64: 1, 1, 1>, scalar_prefetch = 0 : i64, scratch_operands = 4 : i64, tpu.core_type = #tpu.core_type<tc>, window_params = [{transform_indices = @transform_0, window_bounds = array<i64: 1, 8, 128>}, {transform_indices = @transform_1, window_bounds = array<i64: 1, 128, 128>}, {transform_indices = @transform_2, window_bounds = array<i64: 1, 128, 128>}, {transform_indices = @transform_3, window_bounds = array<i64: 1, 8, 128>}]} {
    %c0_i32 = arith.constant 0 : i32
    %0 = arith.cmpi eq, %arg2, %c0_i32 : i32
    %1 = arith.extui %0 : i1 to i32
    %c0_i32_0 = arith.constant 0 : i32
    %2 = arith.cmpi ne, %1, %c0_i32_0 : i32
    scf.if %2 {
      %c0_27 = arith.constant 0 : index
      %c0_28 = arith.constant 0 : index
      %c0_29 = arith.constant 0 : index
      %38 = vector.load %arg3[%c0_27, %c0_28, %c0_29] : memref<1x8x128xf32, #tpu.memory_space<vmem>>, vector<1x8x128xf32>
      %39 = vector.shape_cast %38 : vector<1x8x128xf32> to vector<8x128xf32>
      %cst_30 = arith.constant 11.3137083 : f32
      %40 = vector.broadcast %cst_30 : f32 to vector<8x128xf32>
      %41 = arith.mulf %39, %40 : vector<8x128xf32>
      %c0_31 = arith.constant 0 : index
      %c0_32 = arith.constant 0 : index
      %42 = vector.load %arg7[%c0_31, %c0_32] : memref<8x128xf32, #tpu.memory_space<vmem>>, vector<8x128xf32>
      tpu.vector_store %arg7[%c0_31, %c0_32], %41 {strides = array<i32>} : memref<8x128xf32, #tpu.memory_space<vmem>>, vector<8x128xf32>,
      %cst_33 = arith.constant 0xFF800000 : f32
      %43 = vector.broadcast %cst_33 : f32 to vector<8x1xf32>
      %c0_34 = arith.constant 0 : index
      %c0_35 = arith.constant 0 : index
      %44 = vector.load %arg8[%c0_34, %c0_35] : memref<8x1xf32, #tpu.memory_space<vmem>>, vector<8x1xf32>
      tpu.vector_store %arg8[%c0_34, %c0_35], %43 {strides = array<i32>} : memref<8x1xf32, #tpu.memory_space<vmem>>, vector<8x1xf32>,
      %cst_36 = arith.constant 0.000000e+00 : f32
      %45 = vector.broadcast %cst_36 : f32 to vector<8x1xf32>
      %c0_37 = arith.constant 0 : index
      %c0_38 = arith.constant 0 : index
      %46 = vector.load %arg9[%c0_37, %c0_38] : memref<8x1xf32, #tpu.memory_space<vmem>>, vector<8x1xf32>
      tpu.vector_store %arg9[%c0_37, %c0_38], %45 {strides = array<i32>} : memref<8x1xf32, #tpu.memory_space<vmem>>, vector<8x1xf32>,
      %cst_39 = arith.constant 0.000000e+00 : f32
      %47 = vector.broadcast %cst_39 : f32 to vector<8x128xf32>
      %c0_40 = arith.constant 0 : index
      %c0_41 = arith.constant 0 : index
      %48 = vector.load %arg10[%c0_40, %c0_41] : memref<8x128xf32, #tpu.memory_space<vmem>>, vector<8x128xf32>
      tpu.vector_store %arg10[%c0_40, %c0_41], %47 {strides = array<i32>} : memref<8x128xf32, #tpu.memory_space<vmem>>, vector<8x128xf32>,
    } else {
    }
    %c0 = arith.constant 0 : index
    %c0_1 = arith.constant 0 : index
    %c0_2 = arith.constant 0 : index
    %3 = vector.load %arg4[%c0, %c0_1, %c0_2] : memref<1x128x128xf32, #tpu.memory_space<vmem>>, vector<1x128x128xf32>
    %4 = vector.shape_cast %3 : vector<1x128x128xf32> to vector<128x128xf32>
    %c0_3 = arith.constant 0 : index
    %c0_4 = arith.constant 0 : index
    %c0_5 = arith.constant 0 : index
    %5 = vector.load %arg5[%c0_3, %c0_4, %c0_5] : memref<1x128x128xf32, #tpu.memory_space<vmem>>, vector<1x128x128xf32>
    %6 = vector.shape_cast %5 : vector<1x128x128xf32> to vector<128x128xf32>
    %c0_6 = arith.constant 0 : index
    %c0_7 = arith.constant 0 : index
    %7 = vector.load %arg7[%c0_6, %c0_7] : memref<8x128xf32, #tpu.memory_space<vmem>>, vector<8x128xf32>
    %cst = arith.constant dense<0.000000e+00> : vector<8x128xf32>
    %8 = tpu.matmul %7, %4, %cst {dimension_numbers = #tpu.dot_dimension_numbers<[1], [1], [0], [0], [0, 0, 1, 0], [], []>} : vector<8x128xf32>, vector<128x128xf32>, vector<8x128xf32> -> vector<8x128xf32>
    %c0_i32_8 = arith.constant 0 : i32
    %9 = arith.cmpi eq, %arg2, %c0_i32_8 : i32
    %10 = arith.extui %9 : i1 to i32
    %c0_i32_9 = arith.constant 0 : i32
    %11 = arith.cmpi ne, %10, %c0_i32_9 : i32
    %12 = scf.if %11 -> (vector<8x128xf32>) {
      %38 = tpu.iota {dimensions = array<i32: 1>} : vector<8x128xi32>
      %c1_i32 = arith.constant 1 : i32
      %39 = vector.broadcast %c1_i32 : i32 to vector<8x128xi32>
      %40 = arith.cmpi slt, %38, %39 : vector<8x128xi32>
      %cst_27 = arith.constant 0xFF800000 : f32
      %41 = vector.broadcast %cst_27 : f32 to vector<8x128xf32>
      %42 = arith.select %40, %8, %41 : vector<8x128xi1>, vector<8x128xf32>
      scf.yield %42 : vector<8x128xf32>
    } else {
      scf.yield %8 : vector<8x128xf32>
    }
    %c0_10 = arith.constant 0 : index
    %c0_11 = arith.constant 0 : index
    %13 = vector.load %arg8[%c0_10, %c0_11] : memref<8x1xf32, #tpu.memory_space<vmem>>, vector<8x1xf32>
    %cst_12 = arith.constant dense<0xFF800000> : vector<8xf32>
    %14 = vector.multi_reduction <maximumf>, %12, %cst_12 [1] : vector<8x128xf32> to vector<8xf32>
    %15 = vector.shape_cast %14 : vector<8xf32> to vector<8x1xf32>
    %16 = arith.maximumf %13, %15 : vector<8x1xf32>
    %17 = arith.subf %13, %16 : vector<8x1xf32>
    %18 = math.exp %17 : vector<8x1xf32>
    %19 = vector.broadcast %16 : vector<8x1xf32> to vector<8x128xf32>
    %20 = arith.subf %12, %19 : vector<8x128xf32>
    %21 = math.exp %20 : vector<8x128xf32>
    %c0_13 = arith.constant 0 : index
    %c0_14 = arith.constant 0 : index
    %22 = vector.load %arg9[%c0_13, %c0_14] : memref<8x1xf32, #tpu.memory_space<vmem>>, vector<8x1xf32>
    %23 = arith.mulf %18, %22 : vector<8x1xf32>
    %cst_15 = arith.constant dense<0.000000e+00> : vector<8xf32>
    %24 = vector.multi_reduction <add>, %21, %cst_15 [1] : vector<8x128xf32> to vector<8xf32>
    %25 = vector.shape_cast %24 : vector<8xf32> to vector<8x1xf32>
    %26 = arith.addf %23, %25 : vector<8x1xf32>
    %c0_16 = arith.constant 0 : index
    %c0_17 = arith.constant 0 : index
    %27 = vector.load %arg9[%c0_16, %c0_17] : memref<8x1xf32, #tpu.memory_space<vmem>>, vector<8x1xf32>
    tpu.vector_store %arg9[%c0_16, %c0_17], %26 {strides = array<i32>} : memref<8x1xf32, #tpu.memory_space<vmem>>, vector<8x1xf32>,
    %c0_18 = arith.constant 0 : index
    %c0_19 = arith.constant 0 : index
    %28 = vector.load %arg10[%c0_18, %c0_19] : memref<8x128xf32, #tpu.memory_space<vmem>>, vector<8x128xf32>
    %29 = vector.broadcast %18 : vector<8x1xf32> to vector<8x128xf32>
    %30 = arith.mulf %29, %28 : vector<8x128xf32>
    %cst_20 = arith.constant dense<0.000000e+00> : vector<8x128xf32>
    %31 = tpu.matmul %21, %6, %cst_20 {dimension_numbers = #tpu.dot_dimension_numbers<[1], [0], [0], [1], [0, 0, 1, 1], [], []>} : vector<8x128xf32>, vector<128x128xf32>, vector<8x128xf32> -> vector<8x128xf32>
    %32 = arith.addf %30, %31 : vector<8x128xf32>
    %c0_21 = arith.constant 0 : index
    %c0_22 = arith.constant 0 : index
    %33 = vector.load %arg10[%c0_21, %c0_22] : memref<8x128xf32, #tpu.memory_space<vmem>>, vector<8x128xf32>
    tpu.vector_store %arg10[%c0_21, %c0_22], %32 {strides = array<i32>} : memref<8x128xf32, #tpu.memory_space<vmem>>, vector<8x128xf32>,
    %c0_23 = arith.constant 0 : index
    %c0_24 = arith.constant 0 : index
    %34 = vector.load %arg8[%c0_23, %c0_24] : memref<8x1xf32, #tpu.memory_space<vmem>>, vector<8x1xf32>
    tpu.vector_store %arg8[%c0_23, %c0_24], %16 {strides = array<i32>} : memref<8x1xf32, #tpu.memory_space<vmem>>, vector<8x1xf32>,
    %c0_i32_25 = arith.constant 0 : i32
    %35 = arith.cmpi eq, %arg2, %c0_i32_25 : i32
    %36 = arith.extui %35 : i1 to i32
    %c0_i32_26 = arith.constant 0 : i32
    %37 = arith.cmpi ne, %36, %c0_i32_26 : i32
    scf.if %37 {
      %c0_27 = arith.constant 0 : index
      %c0_28 = arith.constant 0 : index
      %38 = vector.load %arg9[%c0_27, %c0_28] : memref<8x1xf32, #tpu.memory_space<vmem>>, vector<8x1xf32>
      %39 = tpu.reciprocal %38 {approx = true} : vector<8x1xf32> -> vector<8x1xf32>
      %c0_29 = arith.constant 0 : index
      %c0_30 = arith.constant 0 : index
      %40 = vector.load %arg10[%c0_29, %c0_30] : memref<8x128xf32, #tpu.memory_space<vmem>>, vector<8x128xf32>
      %41 = vector.broadcast %39 : vector<8x1xf32> to vector<8x128xf32>
      %42 = arith.mulf %40, %41 : vector<8x128xf32>
      %c0_31 = arith.constant 0 : index
      %c0_32 = arith.constant 0 : index
      %c0_33 = arith.constant 0 : index
      %43 = vector.load %arg6[%c0_31, %c0_32, %c0_33] : memref<1x8x128xf32, #tpu.memory_space<vmem>>, vector<1x8x128xf32>
      %44 = vector.shape_cast %43 : vector<1x8x128xf32> to vector<8x128xf32>
      %45 = vector.shape_cast %42 : vector<8x128xf32> to vector<1x8x128xf32>
      tpu.vector_store %arg6[%c0_31, %c0_32, %c0_33], %45 {strides = array<i32>} : memref<1x8x128xf32, #tpu.memory_space<vmem>>, vector<1x8x128xf32>,
    } else {
    }
    return
  }
  func.func @transform_0(%arg0: i32, %arg1: i32, %arg2: i32) -> (i32, i32, i32) {
    %c0_i32 = arith.constant 0 : i32
    %c0_i32_0 = arith.constant 0 : i32
    return %arg0, %arg1, %c0_i32 : i32, i32, i32
  }
  func.func @transform_1(%arg0: i32, %arg1: i32, %arg2: i32) -> (i32, i32, i32) {
    %c0_i32 = arith.constant 0 : i32
    %c0_i32_0 = arith.constant 0 : i32
    return %arg0, %arg2, %c0_i32 : i32, i32, i32
  }
  func.func @transform_2(%arg0: i32, %arg1: i32, %arg2: i32) -> (i32, i32, i32) {
    %c0_i32 = arith.constant 0 : i32
    %c0_i32_0 = arith.constant 0 : i32
    return %arg0, %arg2, %c0_i32 : i32, i32, i32
  }
  func.func @transform_3(%arg0: i32, %arg1: i32, %arg2: i32) -> (i32, i32, i32) {
    %c0_i32 = arith.constant 0 : i32
    %c0_i32_0 = arith.constant 0 : i32
    return %arg0, %arg1, %c0_i32 : i32, i32, i32
  }
}

</mosaic_0001>

<bundles_post_ra>
// kernel: attention.1
= control target key start
LH: loop header
LB: loop body
LE: loop exit
PB: predicated region body
PF: predicated region fallthrough
CT: control target
= control target key end

     0   :  { %vm21_vm0 = vcmask 7168   ;;  %v171_v18 = vmov -inf   ;;  %v81_v19 = vlaneseq  ;;  %v172_v23 = vmov 0   ;;  %s300_s1 = inlined_call_operand.vmem [shape: f32[1,128,128], index: 1, kind: input, shape index: {}]   ;;  %s301_s0 = inlined_call_operand.vmem [shape: f32[1,8,128], index: 0, kind: input, shape index: {}]   ;;  %s302_s2 = inlined_call_operand.vmem [shape: f32[1,128,128], index: 2, kind: input, shape index: {}]   ;;  %s303_s3 = inlined_call_operand.vmem [shape: f32[1,8,128], index: 3, kind: output, shape index: {}]  }
   0x1   :  { %v40_v0 = vld [vmem:[%s300_s1 + $0x78] sm:$0xff]  ;;  %v39_v1 = vld [vmem:[%s300_s1 + $0x70] sm:$0xff]  ;;  %v38_v2 = vld [vmem:[%s300_s1 + $0x68] sm:$0xff]  ;;  %22 = vst.msk [vmem:[#allocation3] sm:$0xff] %vm21_vm0, %v171_v18  ;;  %162 = vset.pattern.permute.xlu0 %v172_v23  ;;  %163 = vset.pattern.permute.xlu1 %v172_v23  ;;  %v173_v24 = vmov 0.0  }
   0x2   :  { %58 = vmatpush.xpose.msra.mxu0 %v40_v0  ;;  %v37_v3 = vld [vmem:[%s300_s1 + $0x60] sm:$0xff]  ;;  %v36_v4 = vld [vmem:[%s300_s1 + $0x58] sm:$0xff]  ;;  %v35_v5 = vld [vmem:[%s300_s1 + $0x50] sm:$0xff]  ;;  %v82_v20 = vand.u32 127, %v81_v19  ;;  %164 = vset.pattern.permute.xlu2 %v172_v23  ;;  %23 = vst.msk [vmem:[#allocation4] sm:$0xff] %vm21_vm0, %v173_v24 }
   0x3   :  { %v34_v6 = vld [vmem:[%s300_s1 + $0x48] sm:$0xff]  ;;  %v33_v7 = vld [vmem:[%s300_s1 + $0x40] sm:$0xff]  ;;  %v32_v8 = vld [vmem:[%s300_s1 + $0x38] sm:$0xff] }
   0x4   :  { %v31_v9 = vld [vmem:[%s300_s1 + $0x30] sm:$0xff]  ;;  %v30_v10 = vld [vmem:[%s300_s1 + $0x28] sm:$0xff]  ;;  %v29_v11 = vld [vmem:[%s300_s1 + $0x20] sm:$0xff]  ;;  %vm83_vm1 = vcmp.lt.s32.totalorder %v82_v20, 1 }
   0x5   :  { %v28_v12 = vld [vmem:[%s300_s1 + $0x18] sm:$0xff]  ;;  %v27_v13 = vld [vmem:[%s300_s1 + $0x10] sm:$0xff]  ;;  %v26_v14 = vld [vmem:[%s300_s1 + $0x8] sm:$0xff] }
   0x6   :  { %59 = vmatpush.xpose.msra.mxu0 %v39_v1  ;;  %v18_v15 = vld [vmem:[%s301_s0] sm:$0xff]  ;;  %v56_v25 = vld [vmem:[%s302_s2 + $0x78] sm:$0xff]  ;;  %v55_v26 = vld [vmem:[%s302_s2 + $0x70] sm:$0xff] }
   0x7   :  { %v25_v16 = vld [vmem:[%s300_s1] sm:$0xff]  ;;  %v19_v17 = vmul.f32 11.313708, %v18_v15  ;;  %119 = vmatpush.msra.mxu1 %v56_v25  ;;  %v54_v27 = vld [vmem:[%s302_s2 + $0x68] sm:$0xff]  ;;  %v52_v29 = vld [vmem:[%s302_s2 + $0x58] sm:$0xff] }
   0x8   :  { %v53_v28 = vld [vmem:[%s302_s2 + $0x60] sm:$0xff]  ;;  %v51_v30 = vld [vmem:[%s302_s2 + $0x50] sm:$0xff]  ;;  %v50_v31 = vld [vmem:[%s302_s2 + $0x48] sm:$0xff] }
   0x9   :  { %120 = vmatpush.msra.mxu1 %v55_v26  ;;  %v49_v32 = vld [vmem:[%s302_s2 + $0x40] sm:$0xff]  ;;  %v48_v33 = vld [vmem:[%s302_s2 + $0x38] sm:$0xff]  ;;  %v47_v34 = vld [vmem:[%s302_s2 + $0x30] sm:$0xff] }
   0xa   :  { %60 = vmatpush.xpose.msra.mxu0 %v38_v2  ;;  %v90_v35 = vld [vmem:[#allocation3] sm:$0xff]  ;;  %v46_v39 = vld [vmem:[%s302_s2 + $0x28] sm:$0xff]  ;;  %v44_v41 = vld [vmem:[%s302_s2 + $0x18] sm:$0xff] }
   0xb   :  { %121 = vmatpush.msra.mxu1 %v54_v27  ;;  %v45_v40 = vld [vmem:[%s302_s2 + $0x20] sm:$0xff]  ;;  %v43_v42 = vld [vmem:[%s302_s2 + $0x10] sm:$0xff]  ;;  %v42_v43 = vld [vmem:[%s302_s2 + $0x8] sm:$0xff] }
   0xc   :  { %v41_v44 = vld [vmem:[%s302_s2] sm:$0xff]  ;;  %v105_v51 = vld [vmem:[#allocation4] sm:$0xff] }
   0xd   :  { %122 = vmatpush.msra.mxu1 %v53_v28 }
   0xe   :  { %61 = vmatpush.xpose.msra.mxu0 %v37_v3 }
   0xf   :  { %123 = vmatpush.msra.mxu1 %v52_v29 }
  0x11   :  { %124 = vmatpush.msra.mxu1 %v51_v30 }
  0x12   :  { %62 = vmatpush.xpose.msra.mxu0 %v36_v4 }
  0x13   :  { %125 = vmatpush.msra.mxu1 %v50_v31 }
  0x15   :  { %126 = vmatpush.msra.mxu1 %v49_v32 }
  0x16   :  { %63 = vmatpush.xpose.msra.mxu0 %v35_v5 }
  0x17   :  { %127 = vmatpush.msra.mxu1 %v48_v33 }
  0x19   :  { %128 = vmatpush.msra.mxu1 %v47_v34 }
  0x1a   :  { %64 = vmatpush.xpose.msra.mxu0 %v34_v6 }
  0x1b   :  { %129 = vmatpush.msra.mxu1 %v46_v39 }
  0x1d   :  { %130 = vmatpush.msra.mxu1 %v45_v40 }
  0x1e   :  { %65 = vmatpush.xpose.msra.mxu0 %v33_v7 }
  0x1f   :  { %131 = vmatpush.msra.mxu1 %v44_v41 }
  0x21   :  { %132 = vmatpush.msra.mxu1 %v43_v42 }
  0x22   :  { %66 = vmatpush.xpose.msra.mxu0 %v32_v8 }
  0x23   :  { %133 = vmatpush.msra.mxu1 %v42_v43 }
  0x25   :  { %134 = vmatpush.msra.mxu1 %v41_v44 }
  0x26   :  { %67 = vmatpush.xpose.msra.mxu0 %v31_v9 }
  0x2a   :  { %68 = vmatpush.xpose.msra.mxu0 %v30_v10 }
  0x2e   :  { %69 = vmatpush.xpose.msra.mxu0 %v29_v11 }
  0x32   :  { %70 = vmatpush.xpose.msra.mxu0 %v28_v12 }
  0x36   :  { %71 = vmatpush.xpose.msra.mxu0 %v27_v13 }
  0x3a   :  { %72 = vmatpush.xpose.msra.mxu0 %v26_v14 }
  0x3e   :  { %73 = vmatpush.xpose.msra.mxu0 %v25_v16 }
  0x41   :  { %74 = vmatmul.f32.vlgmr.msra.gmra.mxu0 %v19_v17 }
  0xbe   :  { %v75_v21 = vpop.f32.mrf.mxu0 }
  0xbf   :  { %v84_v22 = vsel %vm83_vm1, %v75_v21, -inf }
  0xc0   :  { %91 = vmax.xlane.f32.xlu0 %v84_v22 }
 0x133   :  { %v92_v36 = vpop.xlane.xlu0 %91 }
 0x134   :  { %v93_v37 = vmax.f32 %v90_v35, %v92_v36 }
 0x136   :  { %v94_v38 = vsub.f32 %v90_v35, %v93_v37  ;;  %141 = vst.msk [vmem:[#allocation3] sm:$0xff] %vm21_vm0, %v93_v37  ;;  %99 = vperm.xlu0 %162, %v93_v37  }
 0x138   :  { %v95_v49 = vmul.f32 1.442695, %v94_v38 }
 0x1a8   :  { %v100_v45 = vpop.permute.xlu0 %99 }
 0x1a9   :  { %v102_v46 = vsub.f32 %v84_v22, %v100_v45 }
 0x1ab   :  { %v103_v47 = vmul.f32 1.442695, %v102_v46 }
 0x1ad   :  { %165 = vpow2.f32 %v103_v47 }
 0x1ae   :  { %167 = vpow2.f32 %v95_v49 }
 0x1b3   :  { %v166_v48 = vpop.eup %165 }
 0x1b4   :  { %107 = vadd.xlane.f32.xlu1 %v166_v48  ;;  %135 = vmatmul.f32.vlgmr.msra.gmra.mxu1 %v166_v48  ;;  %v168_v50 = vpop.eup %167 }
 0x1b5   :  { %v106_v52 = vmul.f32 %v168_v50, %v105_v51 }
 0x1cd   :  { %115 = vperm.xlu1 %163, %v168_v50  }
 0x227   :  { %v108_v53 = vpop.xlane.xlu1 %107 }
 0x228   :  { %v109_v54 = vadd.f32 %v108_v53, %v106_v52 }
 0x22a   :  { %111 = vst.msk [vmem:[#allocation4] sm:$0xff] %vm21_vm0, %v109_v54 }
 0x231   :  { %v145_v55 = vld [vmem:[#allocation4] sm:$0xff]  ;;  %v136_v59 = vpop.f32.mrf.mxu1 }
 0x232   :  { %169 = vrcp.f32 %v145_v55 }
 0x238   :  { %v170_v56 = vpop.eup %169 }
 0x239   :  { %150 = vperm.xlu2 %164, %v170_v56  }
 0x23f   :  { %v116_v57 = vpop.permute.xlu1 %115 }
 0x240   :  { %v118_v58 = vmul.f32 0.0, %v116_v57 }
 0x242   :  { %v139_v60 = vadd.f32 %v136_v59, %v118_v58 }
 0x293   :  { %v151_v61 = vpop.permute.xlu2 %150 }
 0x294   :  { %v153_v62 = vmul.f32 %v151_v61, %v139_v60 }
 0x296   :  { %154 = vst [vmem:[%s303_s3] sm:$0xff] %v153_v62 }

</bundles_post_ra>
